<compile_context>
chip_gen: v7x
topology: tpu7x:2x2x1
jax: 0.10.0
libtpu: 0.0.40
codegen_flags: <defaults>
</compile_context>

<pallas_src>
import functools

import jax
import jax.numpy as jnp
from jax.experimental import pallas as pl
from jax.experimental.pallas import tpu as pltpu

LANE = 128
_MIB = 1024 * 1024


# ---------------------------------------------------------------------------
# Kernel
# ---------------------------------------------------------------------------
def _linear_kernel(x_ref, w_ref, b_ref, o_ref, acc_ref):
    """One (i, j, k) grid step of out[i, j] += x[i, k] @ w[k, j]  (+ bias at end).

    x_ref  : (tm, tk)   compute dtype
    w_ref  : (tk, tn)   compute dtype  (weight pre-transposed once in wrapper)
    b_ref  : (1,  tn)   float32
    o_ref  : (tm, tn)   output dtype
    acc_ref: (tm, tn)   float32 VMEM accumulator (persists across the K axis)
    """
    k = pl.program_id(2)

    @pl.when(k == 0)
    def _():
        acc_ref[...] = jnp.zeros_like(acc_ref)

    acc_ref[...] += jnp.dot(
        x_ref[...], w_ref[...], preferred_element_type=jnp.float32
    )

    @pl.when(k == pl.num_programs(2) - 1)
    def _():
        # Bias added exactly once; single cast + lane-dense store.
        o_ref[...] = (acc_ref[...] + b_ref[...]).astype(o_ref.dtype)


# ---------------------------------------------------------------------------
# Tiling helpers
# ---------------------------------------------------------------------------
def _round_up(x, m):
    return (x + m - 1) // m * m


def _pick_tile(dim, align, target):
    """Balanced tile: multiple of `align`, <= round_up(target, align), chosen to
    minimize padding of `dim` (prefers larger tiles on ties)."""
    dim_a = _round_up(dim, align)
    max_tile = min(dim_a, _round_up(target, align))
    nt_min = -(-dim_a // max_tile)
    best_tile, best_pad = None, None
    for nt in range(nt_min, nt_min + 8):
        tile = _round_up(-(-dim // nt), align)
        pad = nt * tile - dim
        if best_pad is None or pad < best_pad:
            best_pad, best_tile = pad, tile
        if pad == dim_a - dim:  # cannot beat pure lane/sublane rounding
            break
    return best_tile


# ---------------------------------------------------------------------------
# Wrapper
# ---------------------------------------------------------------------------
@functools.partial(jax.jit, static_argnames=("compute_dtype",))
def linear_forward(x, weight, bias, *, compute_dtype=None):
    """Pallas equivalent of `Linear.forward`.

    x:      (M, K)
    weight: (N, K)  (PyTorch nn.Linear convention)
    bias:   (N,)
    returns (1, M, N) in x.dtype   (== out.unsqueeze(dim=0))
    """
    out_dtype = x.dtype
    if compute_dtype is None:
        # bf16 MXU inputs by default (f32 accumulation stays in the kernel).
        compute_dtype = jnp.bfloat16 if x.dtype == jnp.float32 else x.dtype
    cdt = jnp.dtype(compute_dtype)
    sublane = {4: 8, 2: 16, 1: 32}.get(cdt.itemsize, 8)

    M, K = x.shape
    N, Kw = weight.shape
    assert K == Kw, "weight must be (out_features, in_features)"

    # ---- balanced, lane-dense tiles ----
    TM_TARGET, TN_TARGET, TK_TARGET = 512, 512, 1024
    tm = _pick_tile(M, sublane, TM_TARGET)
    tn = _pick_tile(N, LANE, TN_TARGET)
    tk = _pick_tile(K, LANE, TK_TARGET)

    m_pad = _round_up(M, tm)
    n_pad = _round_up(N, tn)
    k_pad = _round_up(K, tk)

    # v7x megacore: keep >= 2 tiles on a parallel axis for mid-size problems so
    # both TensorCores get work (v5e/v6e are single-TC; harmless there).
    if m_pad // tm == 1 and n_pad // tn == 1 and n_pad >= 2 * LANE:
        tn = _pick_tile(N, LANE, max(LANE, tn // 2))
        n_pad = _round_up(N, tn)

    # ---- inputs (pad only when the balanced tiles don't already divide) ----
    x_c = x.astype(compute_dtype)
    if (m_pad, k_pad) != (M, K):
        x_c = jnp.pad(x_c, ((0, m_pad - M), (0, k_pad - K)))

    # Layer-constant prep (transpose + pad of W / pad of b). One-time cost per
    # call here; in a real model these would be cached outside the hot path.
    # Pre-transposing to (K, N) keeps the kernel on the plain MXU contraction
    # with no per-grid-step transpose of the weight tile.
    w_t = weight.T.astype(compute_dtype)
    if (k_pad, n_pad) != (K, N):
        w_t = jnp.pad(w_t, ((0, k_pad - K), (0, n_pad - N)))
    b2d = bias.astype(jnp.float32)
    if n_pad != N:
        b2d = jnp.pad(b2d, (0, n_pad - N))
    b2d = b2d.reshape(1, n_pad)

    grid = (m_pad // tm, n_pad // tn, k_pad // tk)
    gm, gn, _ = grid

    cbytes = cdt.itemsize
    obytes = jnp.dtype(out_dtype).itemsize
    cost = pl.CostEstimate(
        flops=2 * m_pad * n_pad * k_pad,
        transcendentals=0,
        bytes_accessed=(
            m_pad * k_pad * cbytes * gn      # x re-read once per N tile
            + k_pad * n_pad * cbytes * gm    # W re-read once per M tile
            + m_pad * n_pad * obytes         # out written once
            + n_pad * 4 * gm                 # bias re-read per M tile
        ),
    )

    # Double-buffered x/W/out tiles + f32 accumulator + bias, with 2x headroom;
    # clamped so it never approaches v7x's 64 MiB physical VMEM.
    vmem_est = (
        2 * tm * tk * cbytes
        + 2 * tk * tn * cbytes
        + tm * tn * 4
        + 2 * tm * tn * obytes
        + 2 * tn * 4
    )
    vmem_limit = int(min(64 * _MIB, max(16 * _MIB, 2 * vmem_est)))

    out = pl.pallas_call(
        _linear_kernel,
        out_shape=jax.ShapeDtypeStruct((m_pad, n_pad), out_dtype),
        grid_spec=pltpu.PrefetchScalarGridSpec(
            num_scalar_prefetch=0,
            grid=grid,
            in_specs=[
                pl.BlockSpec((tm, tk), lambda i, j, k: (i, k)),   # x
                pl.BlockSpec((tk, tn), lambda i, j, k: (k, j)),   # W.T (K, N)
                pl.BlockSpec((1, tn), lambda i, j, k: (0, j)),    # bias
            ],
            out_specs=pl.BlockSpec((tm, tn), lambda i, j, k: (i, j)),
            scratch_shapes=[pltpu.VMEM((tm, tn), jnp.float32)],
        ),
        compiler_params=pltpu.CompilerParams(
            dimension_semantics=("parallel", "parallel", "arbitrary"),
            vmem_limit_bytes=vmem_limit,
        ),
        cost_estimate=cost,
    )(x_c, w_t, b2d)

    if (m_pad, n_pad) != (M, N):
        out = out[:M, :N]
    return out[None, ...]  # out.unsqueeze(dim=0)


# ---------------------------------------------------------------------------
# Demo / correctness check
# ---------------------------------------------------------------------------
if __name__ == "__main__":
    key = jax.random.PRNGKey(0)
    kx, kw, kb, kx2, kw2, kb2 = jax.random.split(key, 6)

    # --- case 1: the module's small demo shapes, f32 compute (tight check) ---
    batch, input_size, output_size = 8, 32, 16
    x = jax.random.normal(kx, (batch, input_size), dtype=jnp.float32)
    bound = 1.0 / jnp.sqrt(jnp.float32(input_size))
    weight = jax.random.uniform(
        kw, (output_size, input_size), minval=-bound, maxval=bound,
        dtype=jnp.float32)
    bias = jax.random.uniform(
        kb, (output_size,), minval=-bound, maxval=bound, dtype=jnp.float32)

    out = linear_forward(x, weight, bias, compute_dtype=jnp.float32)
    jax.block_until_ready(out)
    ref = (x @ weight.T + bias)[None, ...]
    assert out.shape == (1, batch, output_size)
    assert jnp.allclose(out, ref, atol=1e-4, rtol=1e-4), "f32 path mismatch"

    # --- case 2: ragged shapes, multiple K steps, default bf16-MXU path ---
    # K=1050 pads to 1152 (tk=384, 3 K steps); N=200 pads to 256 (2 N tiles).
    M2, K2, N2 = 100, 1050, 200
    x2 = jax.random.normal(kx2, (M2, K2), dtype=jnp.float32)
    bound2 = 1.0 / jnp.sqrt(jnp.float32(K2))
    w2 = jax.random.uniform(kw2, (N2, K2), minval=-bound2, maxval=bound2,
                            dtype=jnp.float32)
    b2 = jax.random.uniform(kb2, (N2,), minval=-bound2, maxval=bound2,
                            dtype=jnp.float32)

    out2 = linear_forward(x2, w2, b2)   # default: bf16 inputs, f32 accumulate
    jax.block_until_ready(out2)
    ref2 = (x2 @ w2.T + b2)[None, ...]
    assert out2.shape == (1, M2, N2)
    assert jnp.allclose(out2, ref2, atol=5e-2, rtol=5e-2), "bf16 path mismatch"

    print("KERNEL_OK")
</pallas_src>

<mosaic_0001>
module attributes {stable_mosaic.version = 11 : i64} {
  func.func @_linear_kernel(%arg0: i32, %arg1: i32, %arg2: i32, %arg3: memref<8x128xf32, #tpu.memory_space<vmem>>, %arg4: memref<128x128xf32, #tpu.memory_space<vmem>>, %arg5: memref<1x128xf32, #tpu.memory_space<vmem>>, %arg6: memref<8x128xf32, #tpu.memory_space<vmem>>, %arg7: memref<8x128xf32, #tpu.memory_space<vmem>>) attributes {dimension_semantics = [#tpu.dimension_semantics<parallel>, #tpu.dimension_semantics<parallel>, #tpu.dimension_semantics<arbitrary>], iteration_bounds = array<i64: 1, 1, 1>, scalar_prefetch = 0 : i64, scratch_operands = 1 : i64, tpu.core_type = #tpu.core_type<tc>, window_params = [{transform_indices = @transform_0, window_bounds = array<i64: 8, 128>}, {transform_indices = @transform_1, window_bounds = array<i64: 128, 128>}, {transform_indices = @transform_2, window_bounds = array<i64: 1, 128>}, {transform_indices = @transform_3, window_bounds = array<i64: 8, 128>}]} {
    %c0_i32 = arith.constant 0 : i32
    %0 = arith.cmpi eq, %arg2, %c0_i32 : i32
    %1 = arith.extui %0 : i1 to i32
    %c0_i32_0 = arith.constant 0 : i32
    %2 = arith.cmpi ne, %1, %c0_i32_0 : i32
    scf.if %2 {
      %cst_10 = arith.constant 0.000000e+00 : f32
      %12 = vector.broadcast %cst_10 : f32 to vector<8x128xf32>
      %c0_11 = arith.constant 0 : index
      %c0_12 = arith.constant 0 : index
      %13 = vector.load %arg7[%c0_11, %c0_12] : memref<8x128xf32, #tpu.memory_space<vmem>>, vector<8x128xf32>
      tpu.vector_store %arg7[%c0_11, %c0_12], %12 {strides = array<i32>} : memref<8x128xf32, #tpu.memory_space<vmem>>, vector<8x128xf32>,
    } else {
    }
    %c0 = arith.constant 0 : index
    %c0_1 = arith.constant 0 : index
    %3 = vector.load %arg7[%c0, %c0_1] : memref<8x128xf32, #tpu.memory_space<vmem>>, vector<8x128xf32>
    %c0_2 = arith.constant 0 : index
    %c0_3 = arith.constant 0 : index
    %4 = vector.load %arg3[%c0_2, %c0_3] : memref<8x128xf32, #tpu.memory_space<vmem>>, vector<8x128xf32>
    %c0_4 = arith.constant 0 : index
    %c0_5 = arith.constant 0 : index
    %5 = vector.load %arg4[%c0_4, %c0_5] : memref<128x128xf32, #tpu.memory_space<vmem>>, vector<128x128xf32>
    %cst = arith.constant dense<0.000000e+00> : vector<8x128xf32>
    %6 = tpu.matmul %4, %5, %cst {dimension_numbers = #tpu.dot_dimension_numbers<[1], [0], [0], [1], [0, 0, 1, 1], [], []>} : vector<8x128xf32>, vector<128x128xf32>, vector<8x128xf32> -> vector<8x128xf32>
    %7 = arith.addf %3, %6 : vector<8x128xf32>
    %c0_6 = arith.constant 0 : index
    %c0_7 = arith.constant 0 : index
    %8 = vector.load %arg7[%c0_6, %c0_7] : memref<8x128xf32, #tpu.memory_space<vmem>>, vector<8x128xf32>
    tpu.vector_store %arg7[%c0_6, %c0_7], %7 {strides = array<i32>} : memref<8x128xf32, #tpu.memory_space<vmem>>, vector<8x128xf32>,
    %c0_i32_8 = arith.constant 0 : i32
    %9 = arith.cmpi eq, %arg2, %c0_i32_8 : i32
    %10 = arith.extui %9 : i1 to i32
    %c0_i32_9 = arith.constant 0 : i32
    %11 = arith.cmpi ne, %10, %c0_i32_9 : i32
    scf.if %11 {
      %c0_10 = arith.constant 0 : index
      %c0_11 = arith.constant 0 : index
      %12 = vector.load %arg7[%c0_10, %c0_11] : memref<8x128xf32, #tpu.memory_space<vmem>>, vector<8x128xf32>
      %c0_12 = arith.constant 0 : index
      %c0_13 = arith.constant 0 : index
      %13 = vector.load %arg5[%c0_12, %c0_13] : memref<1x128xf32, #tpu.memory_space<vmem>>, vector<1x128xf32>
      %14 = vector.broadcast %13 : vector<1x128xf32> to vector<8x128xf32>
      %15 = arith.addf %12, %14 : vector<8x128xf32>
      %c0_14 = arith.constant 0 : index
      %c0_15 = arith.constant 0 : index
      %16 = vector.load %arg6[%c0_14, %c0_15] : memref<8x128xf32, #tpu.memory_space<vmem>>, vector<8x128xf32>
      tpu.vector_store %arg6[%c0_14, %c0_15], %15 {strides = array<i32>} : memref<8x128xf32, #tpu.memory_space<vmem>>, vector<8x128xf32>,
    } else {
    }
    return
  }
  func.func @transform_0(%arg0: i32, %arg1: i32, %arg2: i32) -> (i32, i32) {
    %c0_i32 = arith.constant 0 : i32
    return %arg0, %arg2 : i32, i32
  }
  func.func @transform_1(%arg0: i32, %arg1: i32, %arg2: i32) -> (i32, i32) {
    %c0_i32 = arith.constant 0 : i32
    return %arg2, %arg1 : i32, i32
  }
  func.func @transform_2(%arg0: i32, %arg1: i32, %arg2: i32) -> (i32, i32) {
    %c0_i32 = arith.constant 0 : i32
    %c0_i32_0 = arith.constant 0 : i32
    return %c0_i32, %arg1 : i32, i32
  }
  func.func @transform_3(%arg0: i32, %arg1: i32, %arg2: i32) -> (i32, i32) {
    %c0_i32 = arith.constant 0 : i32
    return %arg0, %arg1 : i32, i32
  }
}

</mosaic_0001>

<bundles_post_ra>
// kernel: linear_forward.1
= control target key start
LH: loop header
LB: loop body
LE: loop exit
PB: predicated region body
PF: predicated region fallthrough
CT: control target
= control target key end

     0   :  { %v206_v0 = vmov 0.0|0.0   ;;  %vm207_vm0 = vmmov 0   ;;  %v208_v4 = vmov 0.0   ;;  %s286_s1 = inlined_call_operand.vmem [shape: f32[128,128], index: 1, kind: input, shape index: {}]   ;;  %s287_s0 = inlined_call_operand.vmem [shape: f32[8,128], index: 0, kind: input, shape index: {}]   ;;  %s288_s2 = inlined_call_operand.vmem [shape: f32[1,128], index: 2, kind: input, shape index: {}]   ;;  %s289_s3 = inlined_call_operand.vmem [shape: f32[8,128], index: 3, kind: output, shape index: {}]  }
   0x1   :  { %179 = vmatprep.subr.bf16.mxu0 %v206_v0  ;;  %v21_v1 = vld [vmem:[%s286_s1] sm:$0xff]  ;;  %v22_v2 = vld [vmem:[%s286_s1 + $0x8] sm:$0xff]  ;;  %v23_v3 = vld [vmem:[%s286_s1 + $0x10] sm:$0xff]  ;;  %176 = vmatprep.mubr.msk.f32.mxu0 %vm207_vm0, %v208_v4 }
   0x2   :  { %v180_v5 = vpack.c.bf16 %v22_v2, %v21_v1  ;;  %v24_v6 = vld [vmem:[%s286_s1 + $0x18] sm:$0xff]  ;;  %v25_v8 = vld [vmem:[%s286_s1 + $0x20] sm:$0xff]  ;;  %v26_v9 = vld [vmem:[%s286_s1 + $0x28] sm:$0xff] }
   0x3   :  { %v183_v7 = vpack.c.bf16 %v24_v6, %v23_v3  ;;  %v186_v10 = vpack.c.bf16 %v26_v9, %v25_v8  ;;  %v27_v11 = vld [vmem:[%s286_s1 + $0x30] sm:$0xff]  ;;  %v28_v12 = vld [vmem:[%s286_s1 + $0x38] sm:$0xff]  ;;  %v29_v14 = vld [vmem:[%s286_s1 + $0x40] sm:$0xff] }
   0x4   :  { %181 = vmatpush3.bf16.msra.mxu0 %v180_v5  ;;  %v189_v13 = vpack.c.bf16 %v28_v12, %v27_v11  ;;  %v30_v15 = vld [vmem:[%s286_s1 + $0x48] sm:$0xff]  ;;  %v31_v17 = vld [vmem:[%s286_s1 + $0x50] sm:$0xff]  ;;  %v32_v18 = vld [vmem:[%s286_s1 + $0x58] sm:$0xff] }
   0x5   :  { %182 = vmatprep.subr.bf16.mxu0 %v206_v0  ;;  %v192_v16 = vpack.c.bf16 %v30_v15, %v29_v14  ;;  %v195_v19 = vpack.c.bf16 %v32_v18, %v31_v17  ;;  %v33_v20 = vld [vmem:[%s286_s1 + $0x60] sm:$0xff]  ;;  %v34_v21 = vld [vmem:[%s286_s1 + $0x68] sm:$0xff]  ;;  %v35_v23 = vld [vmem:[%s286_s1 + $0x70] sm:$0xff] }
   0x6   :  { %v198_v22 = vpack.c.bf16 %v34_v21, %v33_v20  ;;  %v36_v24 = vld [vmem:[%s286_s1 + $0x78] sm:$0xff]  ;;  %v20_v26 = vld [vmem:[%s287_s0] sm:$0xff] }
   0x7   :  { %v201_v25 = vpack.c.bf16 %v36_v24, %v35_v23  ;;  %v126_v27 = vld [vmem:[%s288_s2] ss:$0 sm:$0xff] }
   0x8   :  { %184 = vmatpush3.bf16.msra.mxu0 %v183_v7 }
   0x9   :  { %185 = vmatprep.subr.bf16.mxu0 %v206_v0 }
   0xc   :  { %187 = vmatpush3.bf16.msra.mxu0 %v186_v10 }
   0xd   :  { %188 = vmatprep.subr.bf16.mxu0 %v206_v0 }
  0x10   :  { %190 = vmatpush3.bf16.msra.mxu0 %v189_v13 }
  0x11   :  { %191 = vmatprep.subr.bf16.mxu0 %v206_v0 }
  0x14   :  { %193 = vmatpush3.bf16.msra.mxu0 %v192_v16 }
  0x15   :  { %194 = vmatprep.subr.bf16.mxu0 %v206_v0 }
  0x18   :  { %196 = vmatpush3.bf16.msra.mxu0 %v195_v19 }
  0x19   :  { %197 = vmatprep.subr.bf16.mxu0 %v206_v0 }
  0x1c   :  { %199 = vmatpush3.bf16.msra.mxu0 %v198_v22 }
  0x1d   :  { %200 = vmatprep.subr.bf16.mxu0 %v206_v0 }
  0x20   :  { %202 = vmatpush3.bf16.msra.mxu0 %v201_v25 }
  0x23   :  { %177 = vmatmul.mubr.f32.vlgmr.msra.gmra.mrb[0].mxu0 %v20_v26 }
  0xf6   :  { %v103_v28 = vpop.f32.mrb[0].mxu0 }
  0xf7   :  { %v120_v29 = vadd.f32 %v126_v27, %v103_v28  ;;  %v178_v30 = vpop.f32.mrb[1].mxu0 }
  0xf9   :  { %121 = vst [vmem:[%s289_s3] sm:$0xff] %v120_v29 }

</bundles_post_ra>
